<compile_context>
chip_gen: v5e
topology: v5e:2x2
jax: 0.10.0
libtpu: 0.0.40
codegen_flags: <defaults>
</compile_context>

<pallas_src>
import jax
import jax.numpy as jnp
from jax import lax
from jax.experimental import pallas as pl
from jax.experimental.pallas import tpu as pltpu


def _round_up(x, m):
    return ((x + m - 1) // m) * m


def _make_kernel(*, v_real, bt_real, tbt, vpad, write_logits, compute_loss):
    """Build a kernel body statically specialized on the requested outputs."""
    needs_tail_mask = compute_loss and (bt_real % tbt != 0)

    def kernel(*refs):
        if compute_loss:
            idx_ref, tgt_ref, table_ref = refs[0], refs[1], refs[2]
            outs = refs[3:]
            logits_ref = outs[0] if write_logits else None
            loss_ref = outs[-1]
        else:
            idx_ref, table_ref, logits_ref = refs

        # one-hot encode token ids: (TBT, VPAD); lane axis = (padded) vocab
        col = lax.broadcasted_iota(jnp.int32, (tbt, vpad), 1)
        onehot = (col == idx_ref[...]).astype(jnp.float32)

        # embedding lookup as a full-width MXU matmul: (TBT,VPAD)@(VPAD,VPAD)
        logits = jnp.dot(onehot, table_ref[...],
                         preferred_element_type=jnp.float32)

        if write_logits:
            logits_ref[...] = logits

        if compute_loss:
            # exclude padded vocab columns from the logsumexp
            if v_real != vpad:
                masked = jnp.where(col < v_real, logits, jnp.float32(-1e30))
            else:
                masked = logits
            m = jnp.max(masked, axis=-1, keepdims=True)                 # (TBT,1)
            lse = m + jnp.log(jnp.sum(jnp.exp(masked - m), axis=-1,
                                      keepdims=True))                   # (TBT,1)
            # target logit via select+reduce (reuses `col`, no extra cast/mul)
            tgt_logit = jnp.sum(jnp.where(col == tgt_ref[...], logits, 0.0),
                                axis=-1, keepdims=True)                 # (TBT,1)
            per_tok = lse - tgt_logit                                   # (TBT,1)

            if needs_tail_mask:
                # mask rows beyond the real BT (padded tail of the last tile)
                row = (lax.broadcasted_iota(jnp.int32, (tbt, 1), 0)
                       + pl.program_id(0) * tbt)
                per_tok = jnp.where(row < bt_real, per_tok, 0.0)

            partial = jnp.sum(per_tok)                                  # scalar
            loss_ref[...] = jnp.broadcast_to(partial, (1, 8, 128))

    return kernel


def _launch(idx_flat, table, tgt_flat, *, write_logits, compute_loss,
            block_bt=2048):
    BT = int(idx_flat.shape[0])
    V = int(table.shape[0])

    VPAD = _round_up(max(V, 128), 128)                 # lane-dense vocab width
    TBT = max(8, min(block_bt, _round_up(BT, 8)))      # rows per tile (mult of 8)
    BT_pad = _round_up(BT, TBT)
    G = BT_pad // TBT

    idx_p = jnp.pad(idx_flat.reshape(BT, 1).astype(jnp.int32),
                    ((0, BT_pad - BT), (0, 0)))
    table_p = jnp.pad(table.astype(jnp.float32),
                      ((0, VPAD - V), (0, VPAD - V)))

    inputs = [idx_p]
    in_specs = [pl.BlockSpec((TBT, 1), lambda i: (i, 0))]
    if compute_loss:
        tgt_p = jnp.pad(tgt_flat.reshape(BT, 1).astype(jnp.int32),
                        ((0, BT_pad - BT), (0, 0)))
        inputs.append(tgt_p)
        in_specs.append(pl.BlockSpec((TBT, 1), lambda i: (i, 0)))
    inputs.append(table_p)
    in_specs.append(pl.BlockSpec((VPAD, VPAD), lambda i: (0, 0)))  # resident

    out_shapes = []
    out_specs = []
    if write_logits:
        out_shapes.append(jax.ShapeDtypeStruct((BT_pad, VPAD), jnp.float32))
        out_specs.append(pl.BlockSpec((TBT, VPAD), lambda i: (i, 0)))
    if compute_loss:
        out_shapes.append(jax.ShapeDtypeStruct((G, 8, 128), jnp.float32))
        out_specs.append(pl.BlockSpec((1, 8, 128), lambda i: (i, 0, 0)))

    flops = 2 * BT_pad * VPAD * VPAD
    transcendentals = BT_pad * (VPAD + 1) if compute_loss else 0
    bytes_accessed = (BT_pad * 4 * (2 if compute_loss else 1)   # idx (+targets)
                      + VPAD * VPAD * 4                          # table
                      + (BT_pad * VPAD * 4 if write_logits else 0)
                      + (G * 8 * 128 * 4 if compute_loss else 0))

    kernel = _make_kernel(v_real=V, bt_real=BT, tbt=TBT, vpad=VPAD,
                          write_logits=write_logits, compute_loss=compute_loss)

    outs = pl.pallas_call(
        kernel,
        out_shape=tuple(out_shapes),
        grid_spec=pltpu.PrefetchScalarGridSpec(
            num_scalar_prefetch=0,
            grid=(G,),
            in_specs=in_specs,
            out_specs=tuple(out_specs),
        ),
        compiler_params=pltpu.CompilerParams(
            dimension_semantics=("parallel",),          # shards tiles on v7x
            vmem_limit_bytes=32 * 1024 * 1024,
        ),
        cost_estimate=pl.CostEstimate(flops=flops,
                                      transcendentals=transcendentals,
                                      bytes_accessed=bytes_accessed),
    )(*inputs)

    if not isinstance(outs, (tuple, list)):
        outs = (outs,)

    k = 0
    logits = None
    if write_logits:
        logits = outs[k][:BT, :V]
        k += 1
    loss = None
    if compute_loss:
        loss = jnp.sum(outs[k][:, 0, 0]) / BT            # mean over real tokens
    return logits, loss


def bigram_forward(idx, table, targets=None, *, block_bt=2048):
    """Pallas port of BigramLanguageModel.forward.

    idx:     (B, T) int token ids
    table:   (V, V) float32 embedding table (nn.Embedding weight)
    targets: optional (B, T) int token ids
    Returns (logits, loss) matching the torch module:
      - targets is None  -> logits (B, T, V), loss None
      - targets provided -> logits (B*T, V),  loss scalar (mean cross-entropy)
    """
    B, T = idx.shape
    V = table.shape[0]
    if targets is None:
        logits, _ = _launch(idx.reshape(-1), table, None,
                            write_logits=True, compute_loss=False,
                            block_bt=block_bt)
        return logits.reshape(B, T, V), None
    logits, loss = _launch(idx.reshape(-1), table, targets.reshape(-1),
                           write_logits=True, compute_loss=True,
                           block_bt=block_bt)
    return logits, loss


def bigram_loss(idx, table, targets, *, block_bt=2048):
    """Loss-only fast path: skips the (B*T, V) logits HBM writeback."""
    _, loss = _launch(idx.reshape(-1), table, targets.reshape(-1),
                      write_logits=False, compute_loss=True,
                      block_bt=block_bt)
    return loss


# TODO(synk): `generate` (autoregressive multinomial sampling loop) is host-side
# control flow around the forward pass and is not ported as a kernel.


if __name__ == "__main__":
    key = jax.random.PRNGKey(0)
    k_tab, k_idx, k_tgt = jax.random.split(key, 3)

    vocab_size = 65   # char-level vocab (e.g. tiny Shakespeare)
    B, T = 2, 8

    # nn.Embedding(vocab_size, vocab_size) weight, deterministic init
    table = jax.random.normal(k_tab, (vocab_size, vocab_size), jnp.float32)
    idx = jax.random.randint(k_idx, (B, T), 0, vocab_size, jnp.int32)
    targets = jax.random.randint(k_tgt, (B, T), 0, vocab_size, jnp.int32)

    # training path: logits (B*T, V) + scalar mean cross-entropy
    logits, loss = bigram_forward(idx, table, targets)
    jax.block_until_ready((logits, loss))

    # pure-JAX reference
    ref_logits = table[idx.reshape(-1)]
    ref_lse = jax.nn.logsumexp(ref_logits, axis=-1)
    ref_tgt = jnp.take_along_axis(
        ref_logits, targets.reshape(-1, 1), axis=-1)[:, 0]
    ref_loss = jnp.mean(ref_lse - ref_tgt)

    assert logits.shape == (B * T, vocab_size)
    assert jnp.allclose(logits, ref_logits, atol=1e-5)
    assert jnp.allclose(loss, ref_loss, atol=1e-5)

    # loss-only fast path (no logits writeback)
    loss2 = bigram_loss(idx, table, targets)
    jax.block_until_ready(loss2)
    assert jnp.allclose(loss2, ref_loss, atol=1e-5)

    # inference path (targets=None): logits (B, T, V), loss None, no CE math
    logits_inf, loss_inf = bigram_forward(idx, table, None)
    jax.block_until_ready(logits_inf)
    assert logits_inf.shape == (B, T, vocab_size)
    assert loss_inf is None
    assert jnp.allclose(logits_inf.reshape(-1, vocab_size), ref_logits,
                        atol=1e-5)

    print("KERNEL_OK")
</pallas_src>

<mosaic_0001>
module attributes {stable_mosaic.version = 11 : i64} {
  func.func @kernel(%arg0: i32, %arg1: memref<16x1xi32, #tpu.memory_space<vmem>>, %arg2: memref<16x1xi32, #tpu.memory_space<vmem>>, %arg3: memref<128x128xf32, #tpu.memory_space<vmem>>, %arg4: memref<16x128xf32, #tpu.memory_space<vmem>>, %arg5: memref<1x8x128xf32, #tpu.memory_space<vmem>>) attributes {dimension_semantics = [#tpu.dimension_semantics<parallel>], iteration_bounds = array<i64: 1>, scalar_prefetch = 0 : i64, scratch_operands = 0 : i64, tpu.core_type = #tpu.core_type<tc>, window_params = [{transform_indices = @transform_0, window_bounds = array<i64: 16, 1>}, {transform_indices = @transform_1, window_bounds = array<i64: 16, 1>}, {pipeline_mode = #tpu.pipeline_mode<synchronous>, transform_indices = @transform_2, window_bounds = array<i64: 128, 128>}, {transform_indices = @transform_3, window_bounds = array<i64: 16, 128>}, {transform_indices = @transform_4, window_bounds = array<i64: 1, 8, 128>}]} {
    %0 = tpu.iota {dimensions = array<i32: 1>} : vector<16x128xi32>
    %c0 = arith.constant 0 : index
    %c0_0 = arith.constant 0 : index
    %1 = vector.load %arg1[%c0, %c0_0] : memref<16x1xi32, #tpu.memory_space<vmem>>, vector<16x1xi32>
    %2 = vector.broadcast %1 : vector<16x1xi32> to vector<16x128xi32>
    %3 = arith.cmpi eq, %0, %2 : vector<16x128xi32>
    %4 = arith.extui %3 : vector<16x128xi1> to vector<16x128xi32>
    %5 = arith.sitofp %4 : vector<16x128xi32> to vector<16x128xf32>
    %c0_1 = arith.constant 0 : index
    %c0_2 = arith.constant 0 : index
    %6 = vector.load %arg3[%c0_1, %c0_2] : memref<128x128xf32, #tpu.memory_space<vmem>>, vector<128x128xf32>
    %cst = arith.constant dense<0.000000e+00> : vector<16x128xf32>
    %7 = tpu.matmul %5, %6, %cst {dimension_numbers = #tpu.dot_dimension_numbers<[1], [0], [0], [1], [0, 0, 1, 1], [], []>} : vector<16x128xf32>, vector<128x128xf32>, vector<16x128xf32> -> vector<16x128xf32>
    %c0_3 = arith.constant 0 : index
    %c0_4 = arith.constant 0 : index
    %8 = vector.load %arg4[%c0_3, %c0_4] : memref<16x128xf32, #tpu.memory_space<vmem>>, vector<16x128xf32>
    tpu.vector_store %arg4[%c0_3, %c0_4], %7 {strides = array<i32>} : memref<16x128xf32, #tpu.memory_space<vmem>>, vector<16x128xf32>,
    %c65_i32 = arith.constant 65 : i32
    %9 = vector.broadcast %c65_i32 : i32 to vector<16x128xi32>
    %10 = arith.cmpi slt, %0, %9 : vector<16x128xi32>
    %cst_5 = arith.constant -1.000000e+30 : f32
    %11 = vector.broadcast %cst_5 : f32 to vector<16x128xf32>
    %12 = arith.select %10, %7, %11 : vector<16x128xi1>, vector<16x128xf32>
    %cst_6 = arith.constant dense<0xFF800000> : vector<16xf32>
    %13 = vector.multi_reduction <maximumf>, %12, %cst_6 [1] : vector<16x128xf32> to vector<16xf32>
    %14 = vector.shape_cast %13 : vector<16xf32> to vector<16x1xf32>
    %15 = vector.broadcast %14 : vector<16x1xf32> to vector<16x128xf32>
    %16 = arith.subf %12, %15 : vector<16x128xf32>
    %17 = math.exp %16 : vector<16x128xf32>
    %cst_7 = arith.constant dense<0.000000e+00> : vector<16xf32>
    %18 = vector.multi_reduction <add>, %17, %cst_7 [1] : vector<16x128xf32> to vector<16xf32>
    %19 = vector.shape_cast %18 : vector<16xf32> to vector<16x1xf32>
    %20 = math.log %19 : vector<16x1xf32>
    %21 = arith.addf %14, %20 : vector<16x1xf32>
    %c0_8 = arith.constant 0 : index
    %c0_9 = arith.constant 0 : index
    %22 = vector.load %arg2[%c0_8, %c0_9] : memref<16x1xi32, #tpu.memory_space<vmem>>, vector<16x1xi32>
    %23 = vector.broadcast %22 : vector<16x1xi32> to vector<16x128xi32>
    %24 = arith.cmpi eq, %0, %23 : vector<16x128xi32>
    %cst_10 = arith.constant 0.000000e+00 : f32
    %25 = vector.broadcast %cst_10 : f32 to vector<16x128xf32>
    %26 = arith.select %24, %7, %25 : vector<16x128xi1>, vector<16x128xf32>
    %cst_11 = arith.constant dense<0.000000e+00> : vector<16xf32>
    %27 = vector.multi_reduction <add>, %26, %cst_11 [1] : vector<16x128xf32> to vector<16xf32>
    %28 = vector.shape_cast %27 : vector<16xf32> to vector<16x1xf32>
    %29 = arith.subf %21, %28 : vector<16x1xf32>
    %30 = vector.shape_cast %29 : vector<16x1xf32> to vector<1x16x1xf32>
    %cst_12 = arith.constant dense<0.000000e+00> : vector<1xf32>
    %31 = vector.multi_reduction <add>, %30, %cst_12 [1, 2] : vector<1x16x1xf32> to vector<1xf32>
    %32 = vector.shape_cast %31 : vector<1xf32> to vector<1x1x1xf32>
    %33 = vector.extract %32[0, 0, 0] : f32 from vector<1x1x1xf32>
    %34 = vector.broadcast %33 : f32 to vector<1x8x128xf32>
    %c0_13 = arith.constant 0 : index
    %c0_14 = arith.constant 0 : index
    %c0_15 = arith.constant 0 : index
    %35 = vector.load %arg5[%c0_13, %c0_14, %c0_15] : memref<1x8x128xf32, #tpu.memory_space<vmem>>, vector<1x8x128xf32>
    tpu.vector_store %arg5[%c0_13, %c0_14, %c0_15], %34 {strides = array<i32>} : memref<1x8x128xf32, #tpu.memory_space<vmem>>, vector<1x8x128xf32>,
    return
  }
  func.func @transform_0(%arg0: i32) -> (i32, i32) {
    %c0_i32 = arith.constant 0 : i32
    %c0_i32_0 = arith.constant 0 : i32
    return %arg0, %c0_i32 : i32, i32
  }
  func.func @transform_1(%arg0: i32) -> (i32, i32) {
    %c0_i32 = arith.constant 0 : i32
    %c0_i32_0 = arith.constant 0 : i32
    return %arg0, %c0_i32 : i32, i32
  }
  func.func @transform_2(%arg0: i32) -> (i32, i32) {
    %c0_i32 = arith.constant 0 : i32
    %c0_i32_0 = arith.constant 0 : i32
    %c0_i32_1 = arith.constant 0 : i32
    return %c0_i32, %c0_i32_0 : i32, i32
  }
  func.func @transform_3(%arg0: i32) -> (i32, i32) {
    %c0_i32 = arith.constant 0 : i32
    %c0_i32_0 = arith.constant 0 : i32
    return %arg0, %c0_i32 : i32, i32
  }
  func.func @transform_4(%arg0: i32) -> (i32, i32, i32) {
    %c0_i32 = arith.constant 0 : i32
    %c0_i32_0 = arith.constant 0 : i32
    %c0_i32_1 = arith.constant 0 : i32
    return %arg0, %c0_i32, %c0_i32_0 : i32, i32, i32
  }
}

</mosaic_0001>

<bundles_post_ra>
// kernel: tpu_custom_call.1
= control target key start
LH: loop header
LB: loop body
LE: loop exit
PB: predicated region body
PF: predicated region fallthrough
CT: control target
= control target key end

     0   :  { %10 = vsyncpa [#allocation3], 0  ;;  %s358_s0 = inlined_call_operand.vmem [shape: s32[16,1], index: 0, kind: input, shape index: {}]   ;;  %s359_s1 = inlined_call_operand.vmem [shape: s32[16,1], index: 1, kind: input, shape index: {}]   ;;  %s360_s2 = inlined_call_operand.hbm [shape: f32[128,128], index: 2, kind: input, shape index: {}]   ;;  %s361_s3 = inlined_call_operand.hbm [shape: f32[16,128], index: 3, kind: output, shape index: {0}]   ;;  %s362_s4 = inlined_call_operand.hbm [shape: f32[1,8,128], index: 4, kind: output, shape index: {1}]  }
   0x1   :  { %11 = vsyncpa [#allocation4], 0 }
   0x2   :  { %12 = vsyncpa [#allocation7], 0  ;;  %s21_s17 = sshll.u32 %s360_s2, 4  ;;  %s299_s18 = smov [#allocation2]   ;;  %s22_s17 = int_to_ptr.hbm [resolvable:$true] %s21_s17 }
   0x3   :  { %s23_s19 = sshll.u32 %s299_s18, 4  ;;  %s300_s20 = smov 128   ;;  %s24_s19 = int_to_ptr.vmem [resolvable:$true] %s23_s19 }
   0x4   :  { %s301_s21 = smov 8  }
   0x5   :  { %29 = dma.hbm_to_vmem [thread:$0]  %s22_s17, 2048, %s24_s19, [#allocation3], %s300_s20, %s300_s20, %s301_s21  }
   0x6   :  { %293 = dma.done.wait [#allocation3], 2048  }
   0x7   :  { %294 = vsyncadd [#allocation3], 4294965248  ;;  %v302_v0 = vmov 0   ;;  %v36_v1 = vld [vmem:[%s358_s0] sm:$0xff]  ;;  %v65_v2 = vld [vmem:[#allocation2 + $0x78] sm:$0xff]  ;;  %v34_v21 = vlaneseq  ;;  %v303_v24 = vmov 1.0  }
   0x8   :  { %211 = vset.pattern.permute.xlu0 %v302_v0  ;;  %212 = vset.pattern.permute.xlu2 %v302_v0  ;;  %v64_v3 = vld [vmem:[#allocation2 + $0x70] sm:$0xff]  ;;  %v63_v4 = vld [vmem:[#allocation2 + $0x68] sm:$0xff]  ;;  %v62_v5 = vld [vmem:[#allocation2 + $0x60] sm:$0xff]  ;;  %vm132_vm5 = vcmask 7168   ;;  %s153_s5 = sshll.u32 %s361_s3, 4  ;;  %s305_s6 = smov [#allocation6]   ;;  %s154_s5 = int_to_ptr.hbm [resolvable:$true] %s153_s5 }
   0x9   :  { %39 = vperm.xlu0 %211, %v36_v1   ;;  %66 = vmatpush.msra.mxu0 %v65_v2  ;;  %v37_v6 = vld [vmem:[%s358_s0 + $0x8] sm:$0xff]  ;;  %v61_v7 = vld [vmem:[#allocation2 + $0x58] sm:$0xff]  ;;  %v60_v8 = vld [vmem:[#allocation2 + $0x50] sm:$0xff]  ;;  %v35_v22 = vand.u32 127, %v34_v21  ;;  %s165_s7 = sshll.u32 %s305_s6, 4  ;;  %s167_s3 = sshll.u32 %s362_s4, 4  ;;  %s166_s7 = int_to_ptr.vmem [resolvable:$true] %s165_s7  ;;  %s168_s3 = int_to_ptr.hbm [resolvable:$true] %s167_s3 }
   0xa   :  { %186 = vmatpush.msra.mxu1 %v65_v2  ;;  %v59_v9 = vld [vmem:[#allocation2 + $0x48] sm:$0xff]  ;;  %v58_v10 = vld [vmem:[#allocation2 + $0x40] sm:$0xff]  ;;  %v57_v11 = vld [vmem:[#allocation2 + $0x38] sm:$0xff] }
   0xb   :  { %67 = vmatpush.msra.mxu0 %v64_v3  ;;  %v56_v12 = vld [vmem:[#allocation2 + $0x30] sm:$0xff]  ;;  %v55_v13 = vld [vmem:[#allocation2 + $0x28] sm:$0xff]  ;;  %v54_v14 = vld [vmem:[#allocation2 + $0x20] sm:$0xff]  ;;  %vm91_vm3 = vcmp.lt.s32.totalorder %v35_v22, 65 }
   0xc   :  { %187 = vmatpush.msra.mxu1 %v64_v3  ;;  %v53_v15 = vld [vmem:[#allocation2 + $0x18] sm:$0xff]  ;;  %v52_v16 = vld [vmem:[#allocation2 + $0x10] sm:$0xff]  ;;  %v51_v17 = vld [vmem:[#allocation2 + $0x8] sm:$0xff] }
   0xd   :  { %68 = vmatpush.msra.mxu0 %v63_v4  ;;  %v50_v18 = vld [vmem:[#allocation2] sm:$0xff]  ;;  %v115_v20 = vld [vmem:[%s359_s1 + $0x8] sm:$0xff] }
   0xe   :  { %188 = vmatpush.msra.mxu1 %v63_v4  ;;  %v114_v19 = vld [vmem:[%s359_s1] sm:$0xff]  ;;  %s304_s1 = smov [#allocation5]  }
   0xf   :  { %69 = vmatpush.msra.mxu0 %v62_v5  ;;  %117 = vperm.xlu2 %212, %v114_v19   ;;  %s151_s28 = sshll.u32 %s304_s1, 4  ;;  %s152_s28 = int_to_ptr.vmem [resolvable:$true] %s151_s28 }
  0x10   :  { %189 = vmatpush.msra.mxu1 %v62_v5 }
  0x11   :  { %42 = vperm.xlu0 %211, %v37_v6   ;;  %70 = vmatpush.msra.mxu0 %v61_v7 }
  0x12   :  { %190 = vmatpush.msra.mxu1 %v61_v7 }
  0x13   :  { %71 = vmatpush.msra.mxu0 %v60_v8 }
  0x14   :  { %191 = vmatpush.msra.mxu1 %v60_v8 }
  0x15   :  { %72 = vmatpush.msra.mxu0 %v59_v9 }
  0x16   :  { %192 = vmatpush.msra.mxu1 %v59_v9 }
  0x17   :  { %73 = vmatpush.msra.mxu0 %v58_v10  ;;  %120 = vperm.xlu2 %212, %v115_v20  }
  0x18   :  { %193 = vmatpush.msra.mxu1 %v58_v10 }
  0x19   :  { %74 = vmatpush.msra.mxu0 %v57_v11 }
  0x1a   :  { %194 = vmatpush.msra.mxu1 %v57_v11 }
  0x1b   :  { %75 = vmatpush.msra.mxu0 %v56_v12 }
  0x1c   :  { %195 = vmatpush.msra.mxu1 %v56_v12 }
  0x1d   :  { %76 = vmatpush.msra.mxu0 %v55_v13 }
  0x1e   :  { %196 = vmatpush.msra.mxu1 %v55_v13 }
  0x1f   :  { %77 = vmatpush.msra.mxu0 %v54_v14 }
  0x20   :  { %197 = vmatpush.msra.mxu1 %v54_v14 }
  0x21   :  { %78 = vmatpush.msra.mxu0 %v53_v15 }
  0x22   :  { %198 = vmatpush.msra.mxu1 %v53_v15 }
  0x23   :  { %79 = vmatpush.msra.mxu0 %v52_v16 }
  0x24   :  { %199 = vmatpush.msra.mxu1 %v52_v16 }
  0x25   :  { %80 = vmatpush.msra.mxu0 %v51_v17 }
  0x26   :  { %200 = vmatpush.msra.mxu1 %v51_v17 }
  0x27   :  { %81 = vmatpush.msra.mxu0 %v50_v18 }
  0x28   :  { %201 = vmatpush.msra.mxu1 %v50_v18 }
  0x69   :  { %v118_v26 = vpop.permute.xlu2 %117 }
  0x6a   :  { %vm122_vm2 = vcmp.eq.s32.totalorder %v35_v22, %v118_v26 }
  0x71   :  { %v121_v40 = vpop.permute.xlu2 %120 }
  0x72   :  { %vm123_vm4 = vcmp.eq.s32.totalorder %v35_v22, %v121_v40 }
  0x7b   :  { %v40_v23 = vpop.permute.xlu0 %39 }
  0x7c   :  { %vm44_vm0 = vcmp.eq.s32.totalorder %v35_v22, %v40_v23 }
  0x7d   :  { %184 = vmatmul.msk.f32.vlgmr.msra.gmra.mxu0 %vm44_vm0, %v303_v24 }
  0x83   :  { %v43_v25 = vpop.permute.xlu0 %42 }
  0x84   :  { %vm45_vm1 = vcmp.eq.s32.totalorder %v35_v22, %v43_v25 }
  0x85   :  { %185 = vmatmul.msk.f32.vlgmr.msra.gmra.mxu1 %vm45_vm1, %v303_v24 }
  0xfa   :  { %v83_v27 = vpop.f32.mrf.mxu0 }
  0xfb   :  { %89 = vst [vmem:[#allocation5] sm:$0xff] %v83_v27  ;;  %v124_v28 = vsel %vm122_vm2, %v83_v27, 0.0  ;;  %v92_v29 = vsel %vm91_vm3, %v83_v27, -1e+30 }
  0xfc   :  { %126 = vadd.xlane.f32.xlu2 %v124_v28  ;;  %94 = vmax.xlane.f32.xlu1 %v92_v29 }
 0x102   :  { %v86_v30 = vpop.f32.mrf.mxu1 }
 0x103   :  { %90 = vst [vmem:[#allocation5 + $0x8] sm:$0xff] %v86_v30  ;;  %v93_v31 = vsel %vm91_vm3, %v86_v30, -1e+30  ;;  %v125_v41 = vsel %vm123_vm4, %v86_v30, 0.0 }
 0x104   :  { %96 = vmax.xlane.f32.xlu1 %v93_v31  ;;  %159 = dma.vmem_to_hbm [thread:$0]  %s152_s28, 256, %s154_s5, [#allocation4], %s300_s20, %s300_s20, %s301_s21  }
 0x16f   :  { %v95_v32 = vpop.xlane.xlu1 %94  ;;  %v127_v49 = vpop.xlane.xlu2 %126 }
 0x170   :  { %v98_v33 = vsub.f32 %v92_v29, %v95_v32 }
 0x172   :  { %v100_v34 = vmul.f32 1.442695, %v98_v33 }
 0x174   :  { %213 = vpow2.f32 %v100_v34 }
 0x177   :  { %v97_v35 = vpop.xlane.xlu1 %96 }
 0x178   :  { %v99_v36 = vsub.f32 %v93_v31, %v97_v35 }
 0x17a   :  { %v214_v37 = vpop.eup %213  ;;  %v102_v38 = vmul.f32 1.442695, %v99_v36 }
 0x17b   :  { %104 = vadd.xlane.f32.xlu0 %v214_v37 }
 0x17c   :  { %215 = vpow2.f32 %v102_v38 }
 0x182   :  { %v216_v39 = vpop.eup %215 }
 0x183   :  { %106 = vadd.xlane.f32.xlu1 %v216_v39 }
 0x18b   :  { %128 = vadd.xlane.f32.xlu1 %v125_v41 }
 0x1ee   :  { %v105_v42 = vpop.xlane.xlu0 %104 }
 0x1ef   :  { %217 = vlog2.f32 %v105_v42 }
 0x1f5   :  { %v218_v43 = vpop.eup %217 }
 0x1f6   :  { %v107_v44 = vpop.xlane.xlu1 %106  ;;  %v109_v45 = vmul.f32 0.6931472, %v218_v43 }
 0x1f7   :  { %219 = vlog2.f32 %v107_v44 }
 0x1f8   :  { %v112_v46 = vadd.f32 %v109_v45, %v95_v32 }
 0x1fa   :  { %v130_v51 = vsub.f32 %v112_v46, %v127_v49 }
 0x1fc   :  { %v133_v54 = vsel %vm132_vm5, %v130_v51, 0.0 }
 0x1fd   :  { %v220_v47 = vpop.eup %219 }
 0x1fe   :  { %v111_v48 = vmul.f32 0.6931472, %v220_v47  ;;  %v129_v52 = vpop.xlane.xlu1 %128 }
 0x200   :  { %v113_v50 = vadd.f32 %v111_v48, %v97_v35 }
 0x202   :  { %v131_v53 = vsub.f32 %v113_v50, %v129_v52 }
 0x204   :  { %v134_v55 = vsel %vm132_vm5, %v131_v53, 0.0 }
 0x205   :  { %v135_v56 = vadd.f32 %v134_v55, %v133_v54 }
 0x207   :  { %136 = vadd.xlane.f32.xlu1 %v135_v56 }
 0x27a   :  { %v137_v57 = vpop.xlane.xlu1 %136 }
 0x27b   :  { %v138_v58 = vrot.slane %v137_v57, 4 }
 0x27d   :  { %v139_v59 = vadd.f32 %v138_v58, %v137_v57 }
 0x27f   :  { %v140_v60 = vrot.slane %v139_v59, 2 }
 0x281   :  { %v141_v61 = vadd.f32 %v140_v60, %v139_v59 }
 0x283   :  { %v142_v62 = vrot.slane %v141_v61, 1 }
 0x285   :  { %v143_v63 = vadd.f32 %v142_v62, %v141_v61 }
 0x287   :  { %202 = vpush %v143_v63 }
 0x2b8   :  { %s203_s10 = spop %202 }
 0x2b9   :  { %v145_v0 = vstv %s203_s10 }
 0x2ba   :  { %146 = vst [vmem:[#allocation6] sm:$0xff] %v145_v0 }
 0x2bb   :  { %170 = dma.vmem_to_hbm [thread:$0]  %s166_s7, 128, %s168_s3, [#allocation7]  }
 0x2bc   :  { %295 = dma.done.wait [#allocation4], 256  }
 0x2bd   :  { %296 = vsyncadd [#allocation4], 4294967040 }
 0x2be   :  { %297 = dma.done.wait [#allocation7], 128  }
 0x2bf   :  { %298 = vsyncadd [#allocation7], 4294967168 }
 0x2c0   :  { %179 = vsyncpa [#allocation3], 1 }
 0x2c1   :  { %180 = vsyncpa [#allocation4], 1 }
 0x2c2   :  { %181 = vsyncpa [#allocation7], 1 }

</bundles_post_ra>
